<compile_context>
chip_gen: v5e
topology: v5e:2x2
jax: 0.10.0
libtpu: 0.0.40
codegen_flags: <defaults>
</compile_context>

<pallas_src>
import functools

import jax
import jax.numpy as jnp
from jax.experimental import pallas as pl
from jax.experimental.pallas import tpu as pltpu

_LANE = 128          # vreg lane width
_SUBLANE_F32 = 8     # f32 sublane tile
_SUBLANE_BF16 = 16   # bf16 packed sublane tile


def _round_up(x, m):
    return ((x + m - 1) // m) * m


def _mlp_policy_kernel(x_ref, w1_ref, b1_ref, w2_ref, b2_ref, w3_ref, b3_ref,
                       o_ref):
    """3-layer MLP (leaky_relu, leaky_relu, tanh) for one batch tile.

    MXU inputs are in the weight dtype (f32 or bf16), accumulation is always
    f32, biases and the leaky_relu/tanh epilogue run in f32.
    """
    x = x_ref[...].astype(w1_ref.dtype)

    # Layer 1: Linear(repr_dim, hidden_p) + leaky_relu(0.01)
    h1 = jnp.dot(x, w1_ref[...], preferred_element_type=jnp.float32) + b1_ref[...]
    h1 = jnp.where(h1 > 0, h1, 0.01 * h1).astype(w2_ref.dtype)

    # Layer 2: Linear(hidden_p, hidden_p) + leaky_relu(0.01)
    h2 = jnp.dot(h1, w2_ref[...], preferred_element_type=jnp.float32) + b2_ref[...]
    h2 = jnp.where(h2 > 0, h2, 0.01 * h2).astype(w3_ref.dtype)

    # Layer 3: Linear(hidden_p, action_dims) + tanh output normalisation
    h3 = jnp.dot(h2, w3_ref[...], preferred_element_type=jnp.float32) + b3_ref[...]
    o_ref[...] = jnp.tanh(h3).astype(o_ref.dtype)


def prepare_params(w1, b1, w2, b2, w3, b3, compute_dtype=jnp.bfloat16):
    """Pad/cast the parameters ONCE; reuse the result across policy_forward calls.

    Weights stored as (in_features, out_features) so the kernel computes
    x @ W + b (== PyTorch's x @ W.T + b).

    * Hidden feature dim is zero-padded to a multiple of 128 (lane-dense MXU
      tiles; padded rows/cols are exact zeros -> numerics unchanged).
    * Output feature dim is NOT padded (keeps the HBM writeback minimal).
    * Weights are cast to compute_dtype (bf16 default: high-throughput MXU
      path on v5e/v6e/v7x with f32 accumulation; pass jnp.float32 for an
      exact match to the reference). Biases stay f32.
    """
    repr_dim, hidden = w1.shape
    out_d = w3.shape[1]
    hidden_p = _round_up(hidden, _LANE)

    def pad2(a, rows, cols):
        a = a.reshape((-1, a.shape[-1]))
        return jnp.pad(a, ((0, rows - a.shape[0]), (0, cols - a.shape[1])))

    cd = compute_dtype
    w1p = pad2(w1, repr_dim, hidden_p).astype(cd)
    b1p = pad2(b1, 1, hidden_p).astype(jnp.float32)
    w2p = pad2(w2, hidden_p, hidden_p).astype(cd)
    b2p = pad2(b2, 1, hidden_p).astype(jnp.float32)
    w3p = pad2(w3, hidden_p, out_d).astype(cd)        # rows padded, cols NOT
    b3p = b3.reshape(1, out_d).astype(jnp.float32)
    return w1p, b1p, w2p, b2p, w3p, b3p


@functools.partial(jax.jit, static_argnames=("block_b",))
def policy_forward(s_t, w1p, b1p, w2p, b2p, w3p, b3p, *, block_b=None):
    """Pallas forward of DeterministicPolicyContinuous.

    s_t: (B, repr_dim) float32, unpadded (ragged tail blocks handled by Pallas)
    w*p/b*p: output of prepare_params (hidden padded to 128, weights in the
             chosen compute dtype)
    returns: (B, action_dims) float32
    """
    B, repr_dim = s_t.shape
    hidden_p = w1p.shape[1]
    out_d = w3p.shape[1]

    # bf16 batch tiles must respect the (16,128) packed min-tile; f32 -> (8,128).
    sub = _SUBLANE_BF16 if w1p.dtype == jnp.bfloat16 else _SUBLANE_F32

    if block_b is None:
        max_block = 2048  # fits comfortably under even v5e's 16 MiB scoped VMEM
        if B > 2 * sub:
            # >= 2 grid blocks so "parallel" can shard across both TCs on v7x.
            block_b = min(max_block, _round_up(pl.cdiv(B, 2), sub))
        else:
            block_b = _round_up(max(B, 1), sub)
    block_b = _round_up(int(block_b), sub)

    n_blocks = pl.cdiv(B, block_b)

    # Weights / biases are broadcast to every batch tile (constant index_map).
    full = lambda shape: pl.BlockSpec(shape, lambda i: (0, 0))

    return pl.pallas_call(
        _mlp_policy_kernel,
        out_shape=jax.ShapeDtypeStruct((B, out_d), s_t.dtype),
        grid_spec=pl.GridSpec(
            grid=(n_blocks,),
            in_specs=[
                pl.BlockSpec((block_b, repr_dim), lambda i: (i, 0)),  # s_t tile
                full((repr_dim, hidden_p)),   # W1
                full((1, hidden_p)),          # b1
                full((hidden_p, hidden_p)),   # W2
                full((1, hidden_p)),          # b2
                full((hidden_p, out_d)),      # W3 (cols unpadded)
                full((1, out_d)),             # b3
            ],
            # Output block's last dim equals the full array dim (no 128 pad,
            # no post-call slice).
            out_specs=pl.BlockSpec((block_b, out_d), lambda i: (i, 0)),
        ),
        compiler_params=pltpu.CompilerParams(
            dimension_semantics=("parallel",),   # megacore sharding on v7x
            # Only needed if callers push block_b past the v5e 16 MiB default.
            vmem_limit_bytes=(48 * 1024 * 1024 if block_b >= 4096 else None),
        ),
    )(s_t, w1p, b1p, w2p, b2p, w3p, b3p)


def init_params(key, repr_dim, action_dims):
    """Deterministic synthetic init matching nn.Linear shapes.

    PyTorch Linear(in, out) stores weight (out, in); we store (in, out) so the
    kernel does x @ W. Uniform(-1/sqrt(fan_in), 1/sqrt(fan_in)) like PyTorch.
    """
    hidden = action_dims * 2
    ks = jax.random.split(key, 6)

    def lin(kw, kb, fan_in, fan_out):
        bound = 1.0 / jnp.sqrt(fan_in)
        w = jax.random.uniform(kw, (fan_in, fan_out), jnp.float32, -bound, bound)
        b = jax.random.uniform(kb, (1, fan_out), jnp.float32, -bound, bound)
        return w, b

    w1, b1 = lin(ks[0], ks[1], repr_dim, hidden)
    w2, b2 = lin(ks[2], ks[3], hidden, hidden)
    w3, b3 = lin(ks[4], ks[5], hidden, action_dims)
    return w1, b1, w2, b2, w3, b3


def _reference_forward(s_t, w1, b1, w2, b2, w3, b3):
    """Pure-JAX reference for correctness checking."""
    lrelu = lambda x: jnp.where(x > 0, x, 0.01 * x)
    h1 = lrelu(s_t @ w1 + b1)
    h2 = lrelu(h1 @ w2 + b2)
    return jnp.tanh(h2 @ w3 + b3)


if __name__ == "__main__":
    key = jax.random.PRNGKey(0)
    k_x, k_p = jax.random.split(key)

    batch = 2
    repr_dim = 16    # state representation dim
    action_dims = 4  # -> hidden_dim = 8

    s_t = jax.random.normal(k_x, (batch, repr_dim), jnp.float32)
    params = init_params(k_p, repr_dim, action_dims)
    ref = _reference_forward(s_t, *params)

    # Exact f32 path.
    p_f32 = prepare_params(*params, compute_dtype=jnp.float32)
    a_f32 = jax.block_until_ready(policy_forward(s_t, *p_f32))
    assert a_f32.shape == (batch, action_dims)
    assert jnp.allclose(a_f32, ref, atol=1e-5, rtol=1e-5), "f32 mismatch vs reference"

    # Default high-throughput bf16 MXU path (f32 accumulation).
    p_bf16 = prepare_params(*params)  # compute_dtype=jnp.bfloat16 by default
    a_bf16 = jax.block_until_ready(policy_forward(s_t, *p_bf16))
    assert a_bf16.shape == (batch, action_dims)
    assert jnp.allclose(a_bf16, ref, atol=5e-2, rtol=5e-2), "bf16 mismatch vs reference"

    print("KERNEL_OK")
</pallas_src>

<mosaic_0001>
module attributes {stable_mosaic.version = 11 : i64} {
  func.func @_mlp_policy_kernel(%arg0: i32, %arg1: memref<8x16xf32, #tpu.memory_space<vmem>>, %arg2: memref<16x128xf32, #tpu.memory_space<vmem>>, %arg3: memref<1x128xf32, #tpu.memory_space<vmem>>, %arg4: memref<128x128xf32, #tpu.memory_space<vmem>>, %arg5: memref<1x128xf32, #tpu.memory_space<vmem>>, %arg6: memref<128x4xf32, #tpu.memory_space<vmem>>, %arg7: memref<1x4xf32, #tpu.memory_space<vmem>>, %arg8: memref<8x4xf32, #tpu.memory_space<vmem>>) attributes {dimension_semantics = [#tpu.dimension_semantics<parallel>], iteration_bounds = array<i64: 1>, scalar_prefetch = 0 : i64, scratch_operands = 0 : i64, tpu.core_type = #tpu.core_type<tc>, window_params = [{transform_indices = @transform_0, window_bounds = array<i64: 8, 16>}, {pipeline_mode = #tpu.pipeline_mode<synchronous>, transform_indices = @transform_1, window_bounds = array<i64: 16, 128>}, {pipeline_mode = #tpu.pipeline_mode<synchronous>, transform_indices = @transform_2, window_bounds = array<i64: 1, 128>}, {pipeline_mode = #tpu.pipeline_mode<synchronous>, transform_indices = @transform_3, window_bounds = array<i64: 128, 128>}, {pipeline_mode = #tpu.pipeline_mode<synchronous>, transform_indices = @transform_4, window_bounds = array<i64: 1, 128>}, {pipeline_mode = #tpu.pipeline_mode<synchronous>, transform_indices = @transform_5, window_bounds = array<i64: 128, 4>}, {pipeline_mode = #tpu.pipeline_mode<synchronous>, transform_indices = @transform_6, window_bounds = array<i64: 1, 4>}, {transform_indices = @transform_7, window_bounds = array<i64: 8, 4>}]} {
    %c0 = arith.constant 0 : index
    %c0_0 = arith.constant 0 : index
    %0 = vector.load %arg1[%c0, %c0_0] : memref<8x16xf32, #tpu.memory_space<vmem>>, vector<8x16xf32>
    %c0_1 = arith.constant 0 : index
    %c0_2 = arith.constant 0 : index
    %1 = vector.load %arg2[%c0_1, %c0_2] : memref<16x128xf32, #tpu.memory_space<vmem>>, vector<16x128xf32>
    %cst = arith.constant dense<0.000000e+00> : vector<8x128xf32>
    %2 = tpu.matmul %0, %1, %cst {dimension_numbers = #tpu.dot_dimension_numbers<[1], [0], [0], [1], [0, 0, 1, 1], [], []>} : vector<8x16xf32>, vector<16x128xf32>, vector<8x128xf32> -> vector<8x128xf32>
    %c0_3 = arith.constant 0 : index
    %c0_4 = arith.constant 0 : index
    %3 = vector.load %arg3[%c0_3, %c0_4] : memref<1x128xf32, #tpu.memory_space<vmem>>, vector<1x128xf32>
    %4 = vector.broadcast %3 : vector<1x128xf32> to vector<8x128xf32>
    %5 = arith.addf %2, %4 : vector<8x128xf32>
    %cst_5 = arith.constant 0.000000e+00 : f32
    %6 = vector.broadcast %cst_5 : f32 to vector<8x128xf32>
    %7 = arith.cmpf ogt, %5, %6 : vector<8x128xf32>
    %cst_6 = arith.constant 0.00999999977 : f32
    %8 = vector.broadcast %cst_6 : f32 to vector<8x128xf32>
    %9 = arith.mulf %8, %5 : vector<8x128xf32>
    %10 = arith.select %7, %5, %9 : vector<8x128xi1>, vector<8x128xf32>
    %c0_7 = arith.constant 0 : index
    %c0_8 = arith.constant 0 : index
    %11 = vector.load %arg4[%c0_7, %c0_8] : memref<128x128xf32, #tpu.memory_space<vmem>>, vector<128x128xf32>
    %cst_9 = arith.constant dense<0.000000e+00> : vector<8x128xf32>
    %12 = tpu.matmul %10, %11, %cst_9 {dimension_numbers = #tpu.dot_dimension_numbers<[1], [0], [0], [1], [0, 0, 1, 1], [], []>} : vector<8x128xf32>, vector<128x128xf32>, vector<8x128xf32> -> vector<8x128xf32>
    %c0_10 = arith.constant 0 : index
    %c0_11 = arith.constant 0 : index
    %13 = vector.load %arg5[%c0_10, %c0_11] : memref<1x128xf32, #tpu.memory_space<vmem>>, vector<1x128xf32>
    %14 = vector.broadcast %13 : vector<1x128xf32> to vector<8x128xf32>
    %15 = arith.addf %12, %14 : vector<8x128xf32>
    %cst_12 = arith.constant 0.000000e+00 : f32
    %16 = vector.broadcast %cst_12 : f32 to vector<8x128xf32>
    %17 = arith.cmpf ogt, %15, %16 : vector<8x128xf32>
    %cst_13 = arith.constant 0.00999999977 : f32
    %18 = vector.broadcast %cst_13 : f32 to vector<8x128xf32>
    %19 = arith.mulf %18, %15 : vector<8x128xf32>
    %20 = arith.select %17, %15, %19 : vector<8x128xi1>, vector<8x128xf32>
    %c0_14 = arith.constant 0 : index
    %c0_15 = arith.constant 0 : index
    %21 = vector.load %arg6[%c0_14, %c0_15] : memref<128x4xf32, #tpu.memory_space<vmem>>, vector<128x4xf32>
    %cst_16 = arith.constant dense<0.000000e+00> : vector<8x4xf32>
    %22 = tpu.matmul %20, %21, %cst_16 {dimension_numbers = #tpu.dot_dimension_numbers<[1], [0], [0], [1], [0, 0, 1, 1], [], []>} : vector<8x128xf32>, vector<128x4xf32>, vector<8x4xf32> -> vector<8x4xf32>
    %c0_17 = arith.constant 0 : index
    %c0_18 = arith.constant 0 : index
    %23 = vector.load %arg7[%c0_17, %c0_18] : memref<1x4xf32, #tpu.memory_space<vmem>>, vector<1x4xf32>
    %24 = vector.broadcast %23 : vector<1x4xf32> to vector<8x4xf32>
    %25 = arith.addf %22, %24 : vector<8x4xf32>
    %26 = math.tanh %25 : vector<8x4xf32>
    %c0_19 = arith.constant 0 : index
    %c0_20 = arith.constant 0 : index
    %27 = vector.load %arg8[%c0_19, %c0_20] : memref<8x4xf32, #tpu.memory_space<vmem>>, vector<8x4xf32>
    tpu.vector_store %arg8[%c0_19, %c0_20], %26 {strides = array<i32>} : memref<8x4xf32, #tpu.memory_space<vmem>>, vector<8x4xf32>,
    return
  }
  func.func @transform_0(%arg0: i32) -> (i32, i32) {
    %c0_i32 = arith.constant 0 : i32
    %c0_i32_0 = arith.constant 0 : i32
    return %arg0, %c0_i32 : i32, i32
  }
  func.func @transform_1(%arg0: i32) -> (i32, i32) {
    %c0_i32 = arith.constant 0 : i32
    %c0_i32_0 = arith.constant 0 : i32
    %c0_i32_1 = arith.constant 0 : i32
    return %c0_i32, %c0_i32_0 : i32, i32
  }
  func.func @transform_2(%arg0: i32) -> (i32, i32) {
    %c0_i32 = arith.constant 0 : i32
    %c0_i32_0 = arith.constant 0 : i32
    %c0_i32_1 = arith.constant 0 : i32
    return %c0_i32, %c0_i32_0 : i32, i32
  }
  func.func @transform_3(%arg0: i32) -> (i32, i32) {
    %c0_i32 = arith.constant 0 : i32
    %c0_i32_0 = arith.constant 0 : i32
    %c0_i32_1 = arith.constant 0 : i32
    return %c0_i32, %c0_i32_0 : i32, i32
  }
  func.func @transform_4(%arg0: i32) -> (i32, i32) {
    %c0_i32 = arith.constant 0 : i32
    %c0_i32_0 = arith.constant 0 : i32
    %c0_i32_1 = arith.constant 0 : i32
    return %c0_i32, %c0_i32_0 : i32, i32
  }
  func.func @transform_5(%arg0: i32) -> (i32, i32) {
    %c0_i32 = arith.constant 0 : i32
    %c0_i32_0 = arith.constant 0 : i32
    %c0_i32_1 = arith.constant 0 : i32
    return %c0_i32, %c0_i32_0 : i32, i32
  }
  func.func @transform_6(%arg0: i32) -> (i32, i32) {
    %c0_i32 = arith.constant 0 : i32
    %c0_i32_0 = arith.constant 0 : i32
    %c0_i32_1 = arith.constant 0 : i32
    return %c0_i32, %c0_i32_0 : i32, i32
  }
  func.func @transform_7(%arg0: i32) -> (i32, i32) {
    %c0_i32 = arith.constant 0 : i32
    %c0_i32_0 = arith.constant 0 : i32
    return %arg0, %c0_i32 : i32, i32
  }
}

</mosaic_0001>

<bundles_post_ra>
// kernel: policy_forward.1
= control target key start
LH: loop header
LB: loop body
LE: loop exit
PB: predicated region body
PF: predicated region fallthrough
CT: control target
= control target key end

     0   :  { %12 = vsyncpa [#allocation3], 0  ;;  %s406_s0 = inlined_call_operand.vmem [shape: f32[2,16], index: 0, kind: input, shape index: {}]   ;;  %s407_s1 = inlined_call_operand.hbm [shape: f32[16,128], index: 1, kind: input, shape index: {}]   ;;  %s408_s2 = inlined_call_operand.vmem [shape: f32[1,128], index: 2, kind: input, shape index: {}]   ;;  %s409_s3 = inlined_call_operand.vmem [shape: f32[128,128], index: 3, kind: input, shape index: {}]   ;;  %s410_s4 = inlined_call_operand.vmem [shape: f32[1,128], index: 4, kind: input, shape index: {}]   ;;  %s411_s5 = inlined_call_operand.vmem [shape: f32[128,4], index: 5, kind: input, shape index: {}]   ;;  %s412_s6 = inlined_call_operand.vmem [shape: f32[1,4], index: 6, kind: input, shape index: {}]   ;;  %s413_s7 = inlined_call_operand.hbm [shape: f32[2,4], index: 7, kind: output, shape index: {}]  }
   0x1   :  { %13 = vsyncpa [#allocation4], 0  ;;  %s20_s26 = sshll.u32 %s407_s1, 4  ;;  %s246_s27 = smov [#allocation2]   ;;  %s21_s26 = int_to_ptr.hbm [resolvable:$true] %s20_s26 }
   0x2   :  { %s22_s28 = sshll.u32 %s246_s27, 4  ;;  %s247_s29 = smov 128   ;;  %s23_s28 = int_to_ptr.vmem [resolvable:$true] %s22_s28 }
   0x3   :  { %s248_s30 = smov 8  }
   0x4   :  { %28 = dma.hbm_to_vmem [thread:$0]  %s21_s26, 256, %s23_s28, [#allocation3], %s247_s29, %s247_s29, %s248_s30  }
   0x5   :  { %242 = dma.done.wait [#allocation3], 256  }
   0x6   :  { %243 = vsyncadd [#allocation3], 4294967040  ;;  %v45_v0 = vld [vmem:[#allocation2 + $0x8] sm:$0xff]  ;;  %v44_v1 = vld [vmem:[#allocation2] sm:$0xff]  ;;  %vm50_vm0 = vcmask 130048   ;;  %vm161_vm3 = vcmask 31744  }
   0x7   :  { %68 = vmatpush.msra.mxu0 %v45_v0  ;;  %v43_v2 = vld [vmem:[%s406_s0] sm:$0xff]  ;;  %v92_v3 = vld [vmem:[%s409_s3 + $0x78] sm:$0xff]  ;;  %v91_v4 = vld [vmem:[%s409_s3 + $0x70] sm:$0xff] }
   0x8   :  { %97 = vmatpush.msra.mxu1 %v92_v3  ;;  %v90_v5 = vld [vmem:[%s409_s3 + $0x68] sm:$0xff]  ;;  %v89_v6 = vld [vmem:[%s409_s3 + $0x60] sm:$0xff]  ;;  %v88_v7 = vld [vmem:[%s409_s3 + $0x58] sm:$0xff] }
   0x9   :  { %69 = vmatpush.msra.mxu0 %v44_v1  ;;  %v87_v8 = vld [vmem:[%s409_s3 + $0x50] sm:$0xff]  ;;  %v86_v9 = vld [vmem:[%s409_s3 + $0x48] sm:$0xff]  ;;  %v85_v10 = vld [vmem:[%s409_s3 + $0x40] sm:$0xff] }
   0xa   :  { %182 = vmatmul.msk.f32.vlgmr.msra.gmra.mxu0 %vm50_vm0, %v43_v2  ;;  %98 = vmatpush.msra.mxu1 %v91_v4  ;;  %v84_v11 = vld [vmem:[%s409_s3 + $0x38] sm:$0xff]  ;;  %v83_v12 = vld [vmem:[%s409_s3 + $0x30] sm:$0xff]  ;;  %v82_v13 = vld [vmem:[%s409_s3 + $0x28] sm:$0xff] }
   0xb   :  { %v81_v14 = vld [vmem:[%s409_s3 + $0x20] sm:$0xff]  ;;  %v80_v15 = vld [vmem:[%s409_s3 + $0x18] sm:$0xff]  ;;  %v79_v16 = vld [vmem:[%s409_s3 + $0x10] sm:$0xff] }
   0xc   :  { %99 = vmatpush.msra.mxu1 %v90_v5  ;;  %v78_v17 = vld [vmem:[%s409_s3 + $0x8] sm:$0xff]  ;;  %v77_v18 = vld [vmem:[%s409_s3] sm:$0xff]  ;;  %v135_v19 = vld [vmem:[%s411_s5 + $0x78] sm:$0xff] }
   0xd   :  { %v134_v20 = vld [vmem:[%s411_s5 + $0x70] sm:$0xff]  ;;  %140 = vmatpush.msra.mxu2 %v135_v19  ;;  %v133_v21 = vld [vmem:[%s411_s5 + $0x68] sm:$0xff]  ;;  %v132_v22 = vld [vmem:[%s411_s5 + $0x60] sm:$0xff] }
   0xe   :  { %100 = vmatpush.msra.mxu1 %v89_v6  ;;  %v131_v23 = vld [vmem:[%s411_s5 + $0x58] sm:$0xff]  ;;  %v130_v24 = vld [vmem:[%s411_s5 + $0x50] sm:$0xff]  ;;  %v129_v25 = vld [vmem:[%s411_s5 + $0x48] sm:$0xff] }
   0xf   :  { %141 = vmatpush.msra.mxu2 %v134_v20  ;;  %v128_v26 = vld [vmem:[%s411_s5 + $0x40] sm:$0xff]  ;;  %v127_v27 = vld [vmem:[%s411_s5 + $0x38] sm:$0xff]  ;;  %v126_v28 = vld [vmem:[%s411_s5 + $0x30] sm:$0xff] }
  0x10   :  { %101 = vmatpush.msra.mxu1 %v88_v7  ;;  %v125_v29 = vld [vmem:[%s411_s5 + $0x28] sm:$0xff]  ;;  %v124_v30 = vld [vmem:[%s411_s5 + $0x20] sm:$0xff]  ;;  %v123_v31 = vld [vmem:[%s411_s5 + $0x18] sm:$0xff] }
  0x11   :  { %142 = vmatpush.msra.mxu2 %v133_v21  ;;  %v189_v32 = vld [vmem:[%s408_s2] ss:$0 sm:$0xff]  ;;  %v122_v37 = vld [vmem:[%s411_s5 + $0x10] sm:$0xff]  ;;  %v121_v38 = vld [vmem:[%s411_s5 + $0x8] sm:$0xff] }
  0x12   :  { %102 = vmatpush.msra.mxu1 %v87_v8  ;;  %v120_v39 = vld [vmem:[%s411_s5] sm:$0xff] }
  0x13   :  { %143 = vmatpush.msra.mxu2 %v132_v22  ;;  %v190_v40 = vld [vmem:[%s410_s4] ss:$0 sm:$0xff] }
  0x14   :  { %103 = vmatpush.msra.mxu1 %v86_v9  ;;  %v191_v45 = vld [vmem:[%s412_s6] ss:$0 sm:$0xff] }
  0x15   :  { %144 = vmatpush.msra.mxu2 %v131_v23 }
  0x16   :  { %104 = vmatpush.msra.mxu1 %v85_v10 }
  0x17   :  { %145 = vmatpush.msra.mxu2 %v130_v24 }
  0x18   :  { %105 = vmatpush.msra.mxu1 %v84_v11 }
  0x19   :  { %146 = vmatpush.msra.mxu2 %v129_v25 }
  0x1a   :  { %106 = vmatpush.msra.mxu1 %v83_v12 }
  0x1b   :  { %147 = vmatpush.msra.mxu2 %v128_v26 }
  0x1c   :  { %107 = vmatpush.msra.mxu1 %v82_v13 }
  0x1d   :  { %148 = vmatpush.msra.mxu2 %v127_v27 }
  0x1e   :  { %108 = vmatpush.msra.mxu1 %v81_v14 }
  0x1f   :  { %149 = vmatpush.msra.mxu2 %v126_v28 }
  0x20   :  { %109 = vmatpush.msra.mxu1 %v80_v15 }
  0x21   :  { %150 = vmatpush.msra.mxu2 %v125_v29 }
  0x22   :  { %110 = vmatpush.msra.mxu1 %v79_v16 }
  0x23   :  { %151 = vmatpush.msra.mxu2 %v124_v30 }
  0x24   :  { %111 = vmatpush.msra.mxu1 %v78_v17 }
  0x25   :  { %152 = vmatpush.msra.mxu2 %v123_v31 }
  0x26   :  { %112 = vmatpush.msra.mxu1 %v77_v18 }
  0x27   :  { %153 = vmatpush.msra.mxu2 %v122_v37 }
  0x29   :  { %154 = vmatpush.msra.mxu2 %v121_v38 }
  0x2b   :  { %155 = vmatpush.msra.mxu2 %v120_v39 }
  0x87   :  { %v71_v33 = vpop.f32.mrf.mxu0 }
  0x88   :  { %v72_v34 = vadd.f32 %v189_v32, %v71_v33 }
  0x8a   :  { %vm74_vm1 = vcmp.gt.f32.partialorder %v72_v34, 0.0  ;;  %v75_v35 = vmul.f32 0.01, %v72_v34 }
  0x8c   :  { %v76_v36 = vsel %vm74_vm1, %v72_v34, %v75_v35 }
  0x8d   :  { %113 = vmatmul.f32.vlgmr.msra.gmra.mxu1 %v76_v36 }
 0x10a   :  { %v114_v41 = vpop.f32.mrf.mxu1 }
 0x10b   :  { %v115_v42 = vadd.f32 %v190_v40, %v114_v41 }
 0x10d   :  { %vm117_vm2 = vcmp.gt.f32.partialorder %v115_v42, 0.0  ;;  %v118_v43 = vmul.f32 0.01, %v115_v42 }
 0x10f   :  { %v119_v44 = vsel %vm117_vm2, %v115_v42, %v118_v43 }
 0x110   :  { %156 = vmatmul.f32.vlgmr.msra.gmra.mxu2 %v119_v44 }
 0x193   :  { %v157_v46 = vpop.f32.mrf.mxu2 }
 0x194   :  { %v158_v47 = vadd.f32 %v191_v45, %v157_v46 }
 0x196   :  { %192 = vtanh.f32 %v158_v47 }
 0x19c   :  { %v193_v48 = vpop.eup %192 }
 0x19d   :  { %162 = vst.msk [vmem:[#allocation5] sm:$0xff] %vm161_vm3, %v193_v48 }
 0x19e   :  { %166 = vsyncadd [#allocation4], 96  ;;  %s169_s4 = sshll.u32 %s413_s7, 4  ;;  %s249_s26 = smov [#allocation5]   ;;  %s170_s4 = int_to_ptr.hbm [resolvable:$true] %s169_s4 }
 0x19f   :  { %s167_s27 = sshll.u32 %s249_s26, 4  ;;  %s250_s28 = smov 32   ;;  %s168_s27 = int_to_ptr.vmem [resolvable:$true] %s167_s27 }
 0x1a0   :  { %s251_s29 = smov 2  }
 0x1a1   :  { %175 = dma.vmem_to_hbm [thread:$0]  %s168_s27, 32, %s170_s4, [#allocation4], %s250_s28, %s250_s28, %s251_s29  }
 0x1a2   :  { %244 = dma.done.wait [#allocation4], 128  }
 0x1a3   :  { %245 = vsyncadd [#allocation4], 4294967168 }
 0x1a4   :  { %180 = vsyncpa [#allocation3], 1 }
 0x1a5   :  { %181 = vsyncpa [#allocation4], 1 }

</bundles_post_ra>
